<compile_context>
chip_gen: v7x
topology: tpu7x:2x2x1
jax: 0.10.0
libtpu: 0.0.40
codegen_flags: <defaults>
</compile_context>

<pallas_src>
import functools

import jax
import jax.numpy as jnp
from jax import lax
from jax.experimental import pallas as pl
from jax.experimental.pallas import tpu as pltpu


def _round_up(x, m):
    return (x + m - 1) // m * m


# ----------------------------------------------------------------------------
# Pallas kernel
# ----------------------------------------------------------------------------
def _features_linear_kernel(ids_ref, w_ref, bias_ref, o_ref, *, seg_starts, seg_lens):
    """out[0, b] = sum_f Wpacked[seg_starts[f] + ids[f, b], 0] + bias.

    Layout: batch on the lane axis (lane-dense output), vocab on sublanes.
      ids_ref : (F, TB)  int32   field-local ids, batch-on-lanes
      w_ref   : (Vp, 1)  float32 packed table, each field 8-sublane aligned
      bias_ref: (1, 1)   float32
      o_ref   : (1, TB)  float32
    """
    ids = ids_ref[...]                                     # (F, TB)
    w = w_ref[...]                                         # (Vp, 1)
    tb = ids.shape[1]

    acc = jnp.zeros((1, tb), jnp.float32)
    for f in range(len(seg_starts)):                       # static unroll, F is tiny
        s, L = seg_starts[f], seg_lens[f]                  # python ints, 8-aligned
        seg = w[s:s + L, :]                                # (L, 1) static sublane slice
        v_iota = lax.broadcasted_iota(jnp.int32, (L, tb), 0)
        # Fused one-hot select of the weight (VPU), then one sublane reduction.
        hit = jnp.where(v_iota == ids[f:f + 1, :], seg, 0.0)   # (L, TB)
        acc = acc + jnp.sum(hit, axis=0, keepdims=True)
    o_ref[...] = acc + bias_ref[...]                       # (1, TB) lane-dense store


# ----------------------------------------------------------------------------
# Wrapper
# ----------------------------------------------------------------------------
@functools.partial(jax.jit, static_argnames=("field_dims", "block_b"))
def features_linear(x_ids, emb_w, bias, *, field_dims, block_b=1024):
    """Fused FeaturesLinear forward.

    x_ids:      (B, F) integer field-local indices (as in the torch module)
    emb_w:      (V, 1) embedding table, V = sum(field_dims)
    bias:       (1,)
    field_dims: static tuple of per-field cardinalities
    returns:    (B, 1) float32
    """
    field_dims = tuple(int(d) for d in field_dims)
    B, F = x_ids.shape
    V, D = emb_w.shape
    assert D == 1            # TODO(synk): general output_dim not implemented
    assert F == len(field_dims) and V == sum(field_dims)

    # Static layout of the per-field-padded packed table (folds the offsets).
    offsets, seg_starts, seg_lens = [], [], []
    off = 0
    pstart = 0
    for fd in field_dims:
        offsets.append(off)
        off += fd
        fd_pad = _round_up(fd, 8)                         # sublane-aligned segment
        seg_starts.append(pstart)
        seg_lens.append(fd_pad)
        pstart += fd_pad
    Vp = pstart

    segs = []
    for f, fd in enumerate(field_dims):
        seg = emb_w[offsets[f]:offsets[f] + fd].astype(jnp.float32)
        segs.append(jnp.pad(seg, ((0, seg_lens[f] - fd), (0, 0))))
    w_packed = jnp.concatenate(segs, axis=0)              # (Vp, 1), pad rows are 0

    # Batch on the lane axis; tile must be a multiple of 128 lanes.
    block_b = _round_up(max(block_b, 128), 128)
    tb = min(block_b, _round_up(B, 128))
    bp = _round_up(B, tb)

    ids_t = x_ids.astype(jnp.int32).T                     # (F, B)
    if bp != B:
        # Padded batch columns read index 0 of each field; sliced off below.
        ids_t = jnp.pad(ids_t, ((0, 0), (0, bp - B)))

    bias2d = bias.reshape(1, 1).astype(jnp.float32)

    kernel = functools.partial(
        _features_linear_kernel,
        seg_starts=tuple(seg_starts),
        seg_lens=tuple(seg_lens),
    )

    out = pl.pallas_call(
        kernel,
        out_shape=jax.ShapeDtypeStruct((1, bp), jnp.float32),
        grid=(bp // tb,),
        in_specs=[
            pl.BlockSpec((F, tb), lambda i: (0, i)),      # ids: batch-tiled, pipelined
            pl.BlockSpec((Vp, 1), lambda i: (0, 0)),      # packed table: VMEM-resident
            pl.BlockSpec((1, 1), lambda i: (0, 0)),       # bias: VMEM-resident
        ],
        out_specs=pl.BlockSpec((1, tb), lambda i: (0, i)),  # lane-dense output row
        compiler_params=pltpu.CompilerParams(
            dimension_semantics=("parallel",),            # megacore sharding on v7x
            vmem_limit_bytes=32 * 1024 * 1024),
    )(ids_t, w_packed, bias2d)

    return out.reshape(bp, 1)[:B]                          # (B, 1)


# ----------------------------------------------------------------------------
# Pure-JAX reference
# ----------------------------------------------------------------------------
def features_linear_reference(x_ids, offsets, emb_w, bias):
    ids = x_ids + offsets[None, :]
    return emb_w[ids].sum(axis=1) + bias                  # (B, 1)


# ----------------------------------------------------------------------------
# Demo / self-check
# ----------------------------------------------------------------------------
if __name__ == "__main__":
    key = jax.random.PRNGKey(0)
    k_x, k_w, k_b = jax.random.split(key, 3)

    field_dims = (3, 4, 5, 6)                             # sum(field_dims) = 18
    num_fields = len(field_dims)
    vocab = sum(field_dims)
    offs = [0]
    for d in field_dims[:-1]:
        offs.append(offs[-1] + d)
    offsets = jnp.array(offs, dtype=jnp.int32)            # (0, 3, 7, 12)

    batch = 200
    maxvals = jnp.array(field_dims, dtype=jnp.int32)
    x_ids = jax.random.randint(k_x, (batch, num_fields), 0, maxvals, dtype=jnp.int32)

    emb_w = jax.random.normal(k_w, (vocab, 1), jnp.float32)     # Embedding weight
    bias = 0.1 * jax.random.normal(k_b, (1,), jnp.float32)      # bias parameter

    # block_b=128 so the small demo exercises a multi-step batch grid (2 tiles).
    out = features_linear(x_ids, emb_w, bias, field_dims=field_dims, block_b=128)
    out = jax.block_until_ready(out)

    ref = features_linear_reference(x_ids, offsets, emb_w, bias)
    assert out.shape == (batch, 1), out.shape
    assert jnp.allclose(out, ref, atol=1e-5, rtol=1e-5), "mismatch vs reference"

    print("KERNEL_OK")
</pallas_src>

<mosaic_0001>
module attributes {stable_mosaic.version = 11 : i64} {
  func.func @_features_linear_kernel(%arg0: i32, %arg1: memref<4x128xi32, #tpu.memory_space<vmem>>, %arg2: memref<32x1xf32, #tpu.memory_space<vmem>>, %arg3: memref<1x1xf32, #tpu.memory_space<vmem>>, %arg4: memref<1x128xf32, #tpu.memory_space<vmem>>) attributes {dimension_semantics = [#tpu.dimension_semantics<parallel>], iteration_bounds = array<i64: 2>, scalar_prefetch = 0 : i64, scratch_operands = 0 : i64, tpu.core_type = #tpu.core_type<tc>, window_params = [{transform_indices = @transform_0, window_bounds = array<i64: 4, 128>}, {pipeline_mode = #tpu.pipeline_mode<synchronous>, transform_indices = @transform_1, window_bounds = array<i64: 32, 1>}, {pipeline_mode = #tpu.pipeline_mode<synchronous>, transform_indices = @transform_2, window_bounds = array<i64: 1, 1>}, {transform_indices = @transform_3, window_bounds = array<i64: 1, 128>}]} {
    %c0 = arith.constant 0 : index
    %c0_0 = arith.constant 0 : index
    %0 = vector.load %arg1[%c0, %c0_0] : memref<4x128xi32, #tpu.memory_space<vmem>>, vector<4x128xi32>
    %c0_1 = arith.constant 0 : index
    %c0_2 = arith.constant 0 : index
    %1 = vector.load %arg2[%c0_1, %c0_2] : memref<32x1xf32, #tpu.memory_space<vmem>>, vector<32x1xf32>
    %cst = arith.constant 0.000000e+00 : f32
    %2 = vector.broadcast %cst : f32 to vector<1x128xf32>
    %3 = vector.extract_strided_slice %1 {offsets = [0, 0], sizes = [8, 1], strides = [1, 1]} : vector<32x1xf32> to vector<8x1xf32>
    %4 = tpu.iota {dimensions = array<i32: 0>} : vector<8x128xi32>
    %5 = vector.extract_strided_slice %0 {offsets = [0, 0], sizes = [1, 128], strides = [1, 1]} : vector<4x128xi32> to vector<1x128xi32>
    %6 = vector.broadcast %5 : vector<1x128xi32> to vector<8x128xi32>
    %7 = arith.cmpi eq, %4, %6 : vector<8x128xi32>
    %cst_3 = arith.constant 0.000000e+00 : f32
    %8 = vector.shape_cast %3 : vector<8x1xf32> to vector<8x1xf32>
    %9 = vector.broadcast %8 : vector<8x1xf32> to vector<8x128xf32>
    %10 = vector.broadcast %cst_3 : f32 to vector<8x128xf32>
    %11 = arith.select %7, %9, %10 : vector<8x128xi1>, vector<8x128xf32>
    %cst_4 = arith.constant dense<0.000000e+00> : vector<128xf32>
    %12 = vector.multi_reduction <add>, %11, %cst_4 [0] : vector<8x128xf32> to vector<128xf32>
    %13 = vector.shape_cast %12 : vector<128xf32> to vector<1x128xf32>
    %14 = arith.addf %2, %13 : vector<1x128xf32>
    %15 = vector.extract_strided_slice %1 {offsets = [8, 0], sizes = [8, 1], strides = [1, 1]} : vector<32x1xf32> to vector<8x1xf32>
    %16 = tpu.iota {dimensions = array<i32: 0>} : vector<8x128xi32>
    %17 = vector.extract_strided_slice %0 {offsets = [1, 0], sizes = [1, 128], strides = [1, 1]} : vector<4x128xi32> to vector<1x128xi32>
    %18 = vector.broadcast %17 : vector<1x128xi32> to vector<8x128xi32>
    %19 = arith.cmpi eq, %16, %18 : vector<8x128xi32>
    %cst_5 = arith.constant 0.000000e+00 : f32
    %20 = vector.shape_cast %15 : vector<8x1xf32> to vector<8x1xf32>
    %21 = vector.broadcast %20 : vector<8x1xf32> to vector<8x128xf32>
    %22 = vector.broadcast %cst_5 : f32 to vector<8x128xf32>
    %23 = arith.select %19, %21, %22 : vector<8x128xi1>, vector<8x128xf32>
    %cst_6 = arith.constant dense<0.000000e+00> : vector<128xf32>
    %24 = vector.multi_reduction <add>, %23, %cst_6 [0] : vector<8x128xf32> to vector<128xf32>
    %25 = vector.shape_cast %24 : vector<128xf32> to vector<1x128xf32>
    %26 = arith.addf %14, %25 : vector<1x128xf32>
    %27 = vector.extract_strided_slice %1 {offsets = [16, 0], sizes = [8, 1], strides = [1, 1]} : vector<32x1xf32> to vector<8x1xf32>
    %28 = tpu.iota {dimensions = array<i32: 0>} : vector<8x128xi32>
    %29 = vector.extract_strided_slice %0 {offsets = [2, 0], sizes = [1, 128], strides = [1, 1]} : vector<4x128xi32> to vector<1x128xi32>
    %30 = vector.broadcast %29 : vector<1x128xi32> to vector<8x128xi32>
    %31 = arith.cmpi eq, %28, %30 : vector<8x128xi32>
    %cst_7 = arith.constant 0.000000e+00 : f32
    %32 = vector.shape_cast %27 : vector<8x1xf32> to vector<8x1xf32>
    %33 = vector.broadcast %32 : vector<8x1xf32> to vector<8x128xf32>
    %34 = vector.broadcast %cst_7 : f32 to vector<8x128xf32>
    %35 = arith.select %31, %33, %34 : vector<8x128xi1>, vector<8x128xf32>
    %cst_8 = arith.constant dense<0.000000e+00> : vector<128xf32>
    %36 = vector.multi_reduction <add>, %35, %cst_8 [0] : vector<8x128xf32> to vector<128xf32>
    %37 = vector.shape_cast %36 : vector<128xf32> to vector<1x128xf32>
    %38 = arith.addf %26, %37 : vector<1x128xf32>
    %39 = vector.extract_strided_slice %1 {offsets = [24, 0], sizes = [8, 1], strides = [1, 1]} : vector<32x1xf32> to vector<8x1xf32>
    %40 = tpu.iota {dimensions = array<i32: 0>} : vector<8x128xi32>
    %41 = vector.extract_strided_slice %0 {offsets = [3, 0], sizes = [1, 128], strides = [1, 1]} : vector<4x128xi32> to vector<1x128xi32>
    %42 = vector.broadcast %41 : vector<1x128xi32> to vector<8x128xi32>
    %43 = arith.cmpi eq, %40, %42 : vector<8x128xi32>
    %cst_9 = arith.constant 0.000000e+00 : f32
    %44 = vector.shape_cast %39 : vector<8x1xf32> to vector<8x1xf32>
    %45 = vector.broadcast %44 : vector<8x1xf32> to vector<8x128xf32>
    %46 = vector.broadcast %cst_9 : f32 to vector<8x128xf32>
    %47 = arith.select %43, %45, %46 : vector<8x128xi1>, vector<8x128xf32>
    %cst_10 = arith.constant dense<0.000000e+00> : vector<128xf32>
    %48 = vector.multi_reduction <add>, %47, %cst_10 [0] : vector<8x128xf32> to vector<128xf32>
    %49 = vector.shape_cast %48 : vector<128xf32> to vector<1x128xf32>
    %50 = arith.addf %38, %49 : vector<1x128xf32>
    %c0_11 = arith.constant 0 : index
    %c0_12 = arith.constant 0 : index
    %51 = vector.load %arg3[%c0_11, %c0_12] : memref<1x1xf32, #tpu.memory_space<vmem>>, vector<1x1xf32>
    %52 = vector.broadcast %51 : vector<1x1xf32> to vector<1x128xf32>
    %53 = arith.addf %50, %52 : vector<1x128xf32>
    %c0_13 = arith.constant 0 : index
    %c0_14 = arith.constant 0 : index
    %54 = vector.load %arg4[%c0_13, %c0_14] : memref<1x128xf32, #tpu.memory_space<vmem>>, vector<1x128xf32>
    tpu.vector_store %arg4[%c0_13, %c0_14], %53 {strides = array<i32>} : memref<1x128xf32, #tpu.memory_space<vmem>>, vector<1x128xf32>,
    return
  }
  func.func @transform_0(%arg0: i32) -> (i32, i32) {
    %c0_i32 = arith.constant 0 : i32
    %c0_i32_0 = arith.constant 0 : i32
    return %c0_i32, %arg0 : i32, i32
  }
  func.func @transform_1(%arg0: i32) -> (i32, i32) {
    %c0_i32 = arith.constant 0 : i32
    %c0_i32_0 = arith.constant 0 : i32
    %c0_i32_1 = arith.constant 0 : i32
    return %c0_i32, %c0_i32_0 : i32, i32
  }
  func.func @transform_2(%arg0: i32) -> (i32, i32) {
    %c0_i32 = arith.constant 0 : i32
    %c0_i32_0 = arith.constant 0 : i32
    %c0_i32_1 = arith.constant 0 : i32
    return %c0_i32, %c0_i32_0 : i32, i32
  }
  func.func @transform_3(%arg0: i32) -> (i32, i32) {
    %c0_i32 = arith.constant 0 : i32
    %c0_i32_0 = arith.constant 0 : i32
    return %c0_i32, %arg0 : i32, i32
  }
}

</mosaic_0001>

<bundles_post_ra>
// kernel: features_linear.1
= control target key start
LH: loop header
LB: loop body
LE: loop exit
PB: predicated region body
PF: predicated region fallthrough
CT: control target
= control target key end

     0   :  { %s355_s14 = smov 0   ;;  %s388_s0 = inlined_call_operand.vmem [shape: s32[4,256], index: 0, kind: input, shape index: {}]   ;;  %s389_s1 = inlined_call_operand.vmem [shape: f32[32,1], index: 1, kind: input, shape index: {}]   ;;  %s390_s2 = inlined_call_operand.<no memory space> [shape: f32[1,1], index: 2, kind: input, shape index: {}]   ;;  %s391_s3 = inlined_call_operand.vmem [shape: f32[1,256], index: 3, kind: output, shape index: {}]  }
   0x1   :  { %v8_v0 = vstv %s390_s2 }
   0x2   :  { %9 = vst [vmem:[#allocation2] sm:$0x1] %v8_v0 }
   0x3 LB: > { %s304_s15 = sadd.s32 4294967295, %s329_s14   ;;  %p308_p0 = scmp.ge.s32.totalorder %s329_s14, 1  ;;  %s329_s14 = sphi %s355_s14, %s15_s14  }
   0x4   : > { %p138_p1 = scmp.lt.s32.totalorder %s329_s14, 3 }
   0x6   : > { %p139_p2 = pnand %p308_p0, %p138_p1 }
   0x7   : > { %v169_v1 = vld [vmem:[%s389_s1 + $0x10] sm:$0xff] (!%p139_p2)  ;;  %v167_v2 = vld [vmem:[%s389_s1] sm:$0xff] (!%p139_p2)  ;;  %v331_v3 = vmov (!%p139_p2), 0   ;;  %v170_v4 = vld [vmem:[%s389_s1 + $0x18] sm:$0xff] (!%p139_p2)  ;;  %p159_p3 = scmp.lt.s32.totalorder (!%p139_p2), %s304_s15, 1  ;;  %v171_v7 = vlaneseq (!%p139_p2) }
   0x8   : > { %142 = sbr.rel (%p139_p2) target bundleno = 163 (0xa3), region = 32  ;;  %322 = vset.pattern.permute.xlu1 (!%p139_p2), %v331_v3  ;;  %321 = vset.pattern.permute.xlu0 (!%p139_p2), %v331_v3  ;;  %v168_v5 = vld [vmem:[%s389_s1 + $0x8] sm:$0xff] (!%p139_p2) }
   0x9   : > { %216 = vperm.xlu1 (!%p139_p2), %322, %v169_v1   ;;  %180 = vperm.xlu0 (!%p139_p2), %321, %v167_v2   ;;  %v245_v6 = vld [vmem:[#allocation2] sm:$0x1] (!%p139_p2)  ;;  %v172_v8 = vshrl.u32 (!%p139_p2), %v171_v7, 7 }
   0xb   : > { %v211_v9 = vsub.s32 (!%p139_p2), 2, %v172_v8  ;;  %v175_v10 = vsub.s32 (!%p139_p2), 0, %v172_v8  ;;  %v229_v14 = vsub.s32 (!%p139_p2), 3, %v172_v8  ;;  %v193_v15 = vsub.s32 (!%p139_p2), 1, %v172_v8 }
   0xd   : > { %234 = vperm.xlu1 (!%p139_p2), %322, %v170_v4   ;;  %198 = vperm.xlu0 (!%p139_p2), %321, %v168_v5  }
   0xf   : > { %s393_s15 = smov (!%p159_p3, %s304_s15), 1 }
  0x10   : > { %s309_s23 = sshll.u32 %s393_s15, 2  ;;  %s165_s29 = scalar_lea.vmem %s391_s3, %s393_s15 }
  0x11   : > { %248 = vperm.xlu0 %321, %v245_v6   ;;  %s162_s26 = scalar_lea.vmem %s388_s0, %s309_s23 }
  0x12   : > { %v166_v11 = vld [vmem:[%s162_s26] sm:$0xf] }
  0x13   : > { %v212_v12 = vrot.slane %v166_v11, %v211_v9  ;;  %v176_v13 = vrot.slane %v166_v11, %v175_v10  ;;  %v230_v16 = vrot.slane %v166_v11, %v229_v14  ;;  %v194_v17 = vrot.slane %v166_v11, %v193_v15 }
  0x15   : > { %vm213_vm0 = vcmp.eq.s32.totalorder %v172_v8, %v212_v12  ;;  %vm177_vm1 = vcmp.eq.s32.totalorder %v172_v8, %v176_v13  ;;  %vm231_vm2 = vcmp.eq.s32.totalorder %v172_v8, %v230_v16  ;;  %vm195_vm3 = vcmp.eq.s32.totalorder %v172_v8, %v194_v17 }
  0x88   : > { %v217_v18 = vpop.permute.xlu1 %216  ;;  %v181_v19 = vpop.permute.xlu0 %180 }
  0x89   : > { %v219_v20 = vsel %vm213_vm0, %v217_v18, 0.0  ;;  %v183_v21 = vsel %vm177_vm1, %v181_v19, 0.0 }
  0x8a   : > { %v220_v22 = vrot.slane %v219_v20, 4  ;;  %v184_v23 = vrot.slane %v183_v21, 4 }
  0x8c   : > { %v221_v24 = vadd.f32 %v220_v22, %v219_v20  ;;  %v185_v25 = vadd.f32 %v184_v23, %v183_v21  ;;  %v235_v26 = vpop.permute.xlu1 %234  ;;  %v199_v27 = vpop.permute.xlu0 %198 }
  0x8d   : > { %v237_v28 = vsel %vm231_vm2, %v235_v26, 0.0  ;;  %v201_v29 = vsel %vm195_vm3, %v199_v27, 0.0 }
  0x8e   : > { %v222_v30 = vrot.slane %v221_v24, 2  ;;  %v186_v31 = vrot.slane %v185_v25, 2  ;;  %v238_v32 = vrot.slane %v237_v28, 4  ;;  %v202_v33 = vrot.slane %v201_v29, 4 }
  0x90   : > { %v187_v34 = vadd.f32 %v186_v31, %v185_v25  ;;  %v239_v35 = vadd.f32 %v238_v32, %v237_v28  ;;  %v203_v36 = vadd.f32 %v202_v33, %v201_v29  ;;  %v223_v37 = vadd.f32 %v222_v30, %v221_v24  ;;  %v249_v50 = vpop.permute.xlu0 %248 }
  0x91   : > { %v254_v54 = vrot.slane %v249_v50, %v175_v10 }
  0x92   : > { %v240_v38 = vrot.slane %v239_v35, 2  ;;  %v204_v39 = vrot.slane %v203_v36, 2  ;;  %v188_v40 = vrot.slane %v187_v34, 1  ;;  %v224_v43 = vrot.slane %v223_v37, 1 }
  0x94   : > { %v241_v41 = vadd.f32 %v240_v38, %v239_v35  ;;  %v205_v42 = vadd.f32 %v204_v39, %v203_v36  ;;  %v189_v45 = vadd.f32 %v188_v40, %v187_v34  ;;  %v225_v48 = vadd.f32 %v224_v43, %v223_v37 }
  0x96   : > { %v206_v44 = vrot.slane %v205_v42, 1  ;;  %v242_v46 = vrot.slane %v241_v41, 1 }
  0x98   : > { %v207_v47 = vadd.f32 %v206_v44, %v205_v42  ;;  %v243_v51 = vadd.f32 %v242_v46, %v241_v41 }
  0x9a   : > { %v208_v49 = vadd.f32 %v207_v47, %v189_v45 }
  0x9c   : > { %v226_v52 = vadd.f32 %v225_v48, %v208_v49 }
  0x9e   : > { %v244_v53 = vadd.f32 %v243_v51, %v226_v52 }
  0xa0   : > { %v255_v55 = vadd.f32 %v254_v54, %v244_v53 }
  0xa2   : > { %256 = vst [vmem:[%s165_s29] sm:$0x1] %v255_v55 }
  0xa3 PF: > { %s15_s14 = sadd.s32 1, %s329_s14  }
  0xa4   : > { %p12_p4 = scmp.ge.s32.totalorder %s15_s14, 4  }
  0xa6   :  { %14 = sbr.rel (!%p12_p4) target bundleno = 3 (0x3), region = 62 }

</bundles_post_ra>
